<compile_context>
chip_gen: v6e
topology: v6e:2x2x1
jax: 0.10.0
libtpu: 0.0.40
codegen_flags: <defaults>
</compile_context>

<pallas_src>
import functools

import jax
import jax.numpy as jnp
from jax.experimental import pallas as pl
from jax.experimental.pallas import tpu as pltpu


def _round_up(x, m):
    return ((x + m - 1) // m) * m


def _mlp_fused_kernel(x_ref, wh_ref, bh_ref, wo_ref, bo_ref, o_ref, *,
                      n_hidden, compute_dtype):
    """Fused MLP forward over one batch tile.

    x_ref : (tm, Dp)      f32  input rows (zero-padded features)
    wh_ref: (Lh, Dp, Dp)  bf16 hidden weights (pre-transposed, zero-padded)
    bh_ref: (Lh, 1, Dp)   f32  hidden biases (zero-padded)
    wo_ref: (Dp, Do_p)    bf16 output weight
    bo_ref: (1, Do_p)     f32  output bias
    o_ref : (tm, Do_p)    f32  output rows
    """
    h = x_ref[...].astype(compute_dtype)
    # Hidden layers: Linear(in, in) + ReLU. Statically unrolled (small, fixed
    # layer count) so the scheduler sees the whole chain.
    for l in range(n_hidden):
        y = jnp.dot(h, wh_ref[l], preferred_element_type=jnp.float32)
        y = y + bh_ref[l]               # f32 bias add, broadcasts (1,Dp)->(tm,Dp)
        y = jnp.maximum(y, 0.0)         # ReLU in f32 (VPU)
        h = y.astype(compute_dtype)     # back to matmul dtype for next layer
    # Final layer: Linear(in, out), no activation.
    y = jnp.dot(h, wo_ref[...], preferred_element_type=jnp.float32)
    y = y + bo_ref[...]
    o_ref[...] = y.astype(o_ref.dtype)


class MLPPallas:
    """Mirror of the PyTorch MLP: (num_layers-1) x [Linear(in,in), ReLU]
    followed by Linear(in, out), executed as one fused Pallas kernel."""

    def __init__(self, in_channels, num_layers, out_channels, key,
                 compute_dtype=jnp.bfloat16):
        assert num_layers >= 1
        self.in_channels = in_channels
        self.out_channels = out_channels
        self.n_hidden = num_layers - 1
        self.compute_dtype = compute_dtype

        self.din_p = _round_up(in_channels, 128)
        self.dout_p = _round_up(out_channels, 128)

        bound = 1.0 / (in_channels ** 0.5)  # PyTorch nn.Linear default init
        hidden = []
        for _ in range(self.n_hidden):
            key, kw, kb = jax.random.split(key, 3)
            w = jax.random.uniform(kw, (in_channels, in_channels), jnp.float32,
                                   minval=-bound, maxval=bound)   # (out, in)
            b = jax.random.uniform(kb, (in_channels,), jnp.float32,
                                   minval=-bound, maxval=bound)
            hidden.append((w, b))
        key, kw, kb = jax.random.split(key, 3)
        w_last = jax.random.uniform(kw, (out_channels, in_channels), jnp.float32,
                                    minval=-bound, maxval=bound)
        b_last = jax.random.uniform(kb, (out_channels,), jnp.float32,
                                    minval=-bound, maxval=bound)

        # Unpadded f32 copies for the reference check.
        self.ref_params = list(hidden) + [(w_last, b_last)]

        # Packed, padded, pre-transposed (Din, Dout) parameters.
        lh = max(self.n_hidden, 1)  # keep at least a dummy slot when n_hidden==0
        wh = jnp.zeros((lh, self.din_p, self.din_p), compute_dtype)
        bh = jnp.zeros((lh, 1, self.din_p), jnp.float32)
        for l, (w, b) in enumerate(hidden):
            wh = wh.at[l, :in_channels, :in_channels].set(
                w.T.astype(compute_dtype))
            bh = bh.at[l, 0, :in_channels].set(b)
        wo = jnp.zeros((self.din_p, self.dout_p), compute_dtype)
        wo = wo.at[:in_channels, :out_channels].set(w_last.T.astype(compute_dtype))
        bo = jnp.zeros((1, self.dout_p), jnp.float32)
        bo = bo.at[0, :out_channels].set(b_last)
        self.wh, self.bh, self.wo, self.bo = wh, bh, wo, bo

    def __call__(self, x):
        B, din = x.shape
        assert din == self.in_channels
        # Batch tile: multiple of 8 (f32 sublane), capped at 256 rows.
        tm = 256 if B >= 256 else _round_up(max(B, 8), 8)
        b_pad = _round_up(B, tm)

        x_p = jnp.zeros((b_pad, self.din_p), jnp.float32)
        x_p = x_p.at[:B, :din].set(x.astype(jnp.float32))

        lh = self.wh.shape[0]
        kernel = functools.partial(
            _mlp_fused_kernel,
            n_hidden=self.n_hidden,
            compute_dtype=self.compute_dtype,
        )
        out_p = pl.pallas_call(
            kernel,
            out_shape=jax.ShapeDtypeStruct((b_pad, self.dout_p), jnp.float32),
            grid=(b_pad // tm,),
            in_specs=[
                pl.BlockSpec((tm, self.din_p), lambda i: (i, 0)),
                # Weights/biases: constant block index -> stay VMEM-resident
                # across batch tiles (no re-DMA per grid step).
                pl.BlockSpec((lh, self.din_p, self.din_p), lambda i: (0, 0, 0)),
                pl.BlockSpec((lh, 1, self.din_p), lambda i: (0, 0, 0)),
                pl.BlockSpec((self.din_p, self.dout_p), lambda i: (0, 0)),
                pl.BlockSpec((1, self.dout_p), lambda i: (0, 0)),
            ],
            out_specs=pl.BlockSpec((tm, self.dout_p), lambda i: (i, 0)),
            compiler_params=pltpu.CompilerParams(
                dimension_semantics=("parallel",),
            ),
        )(x_p, self.wh, self.bh, self.wo, self.bo)
        return out_p[:B, :self.out_channels]


if __name__ == "__main__":
    key = jax.random.PRNGKey(0)
    key, kx, kp = jax.random.split(key, 3)

    batch = 8
    in_channels = 32
    num_layers = 3
    out_channels = 16

    x = jax.random.normal(kx, (batch, in_channels), jnp.float32)

    model = MLPPallas(in_channels, num_layers, out_channels, key=kp)
    out = jax.block_until_ready(model(x))
    assert out.shape == (batch, out_channels)

    # Mirrored reference: same bf16 operand casts, f32 accumulation/epilogue.
    cd = model.compute_dtype
    h = x
    n_layers_total = len(model.ref_params)
    for li, (w, b) in enumerate(model.ref_params):
        y = jnp.dot(h.astype(cd), w.T.astype(cd),
                    preferred_element_type=jnp.float32) + b
        if li < n_layers_total - 1:
            y = jnp.maximum(y, 0.0)
        h = y
    ref_mirror = h

    # Pure f32 reference of the original PyTorch math (loose tol for bf16).
    h = x
    for li, (w, b) in enumerate(model.ref_params):
        y = h @ w.T + b
        if li < n_layers_total - 1:
            y = jnp.maximum(y, 0.0)
        h = y
    ref_f32 = h

    assert jnp.allclose(out, ref_mirror, atol=1e-3, rtol=1e-3), (
        "mismatch vs mirrored bf16 reference")
    assert jnp.allclose(out, ref_f32, atol=5e-2, rtol=5e-2), (
        "mismatch vs pure f32 reference")

    print("KERNEL_OK")
</pallas_src>

<mosaic_0001>
module attributes {stable_mosaic.version = 11 : i64} {
  func.func @_mlp_fused_kernel(%arg0: i32, %arg1: memref<8x128xf32, #tpu.memory_space<vmem>>, %arg2: memref<2x128x128xbf16, #tpu.memory_space<vmem>>, %arg3: memref<2x1x128xf32, #tpu.memory_space<vmem>>, %arg4: memref<128x128xbf16, #tpu.memory_space<vmem>>, %arg5: memref<1x128xf32, #tpu.memory_space<vmem>>, %arg6: memref<8x128xf32, #tpu.memory_space<vmem>>) attributes {dimension_semantics = [#tpu.dimension_semantics<parallel>], iteration_bounds = array<i64: 1>, scalar_prefetch = 0 : i64, scratch_operands = 0 : i64, tpu.core_type = #tpu.core_type<tc>, window_params = [{transform_indices = @transform_0, window_bounds = array<i64: 8, 128>}, {pipeline_mode = #tpu.pipeline_mode<synchronous>, transform_indices = @transform_1, window_bounds = array<i64: 2, 128, 128>}, {pipeline_mode = #tpu.pipeline_mode<synchronous>, transform_indices = @transform_2, window_bounds = array<i64: 2, 1, 128>}, {pipeline_mode = #tpu.pipeline_mode<synchronous>, transform_indices = @transform_3, window_bounds = array<i64: 128, 128>}, {pipeline_mode = #tpu.pipeline_mode<synchronous>, transform_indices = @transform_4, window_bounds = array<i64: 1, 128>}, {transform_indices = @transform_5, window_bounds = array<i64: 8, 128>}]} {
    %c0 = arith.constant 0 : index
    %c0_0 = arith.constant 0 : index
    %0 = vector.load %arg1[%c0, %c0_0] : memref<8x128xf32, #tpu.memory_space<vmem>>, vector<8x128xf32>
    %1 = arith.truncf %0 : vector<8x128xf32> to vector<8x128xbf16>
    %c0_1 = arith.constant 0 : index
    %c0_2 = arith.constant 0 : index
    %c0_3 = arith.constant 0 : index
    %2 = vector.load %arg2[%c0_1, %c0_2, %c0_3] : memref<2x128x128xbf16, #tpu.memory_space<vmem>>, vector<1x128x128xbf16>
    %3 = vector.shape_cast %2 : vector<1x128x128xbf16> to vector<128x128xbf16>
    %cst = arith.constant dense<0.000000e+00> : vector<8x128xf32>
    %4 = tpu.matmul %1, %3, %cst {dimension_numbers = #tpu.dot_dimension_numbers<[1], [0], [0], [1], [0, 0, 1, 1], [], []>} : vector<8x128xbf16>, vector<128x128xbf16>, vector<8x128xf32> -> vector<8x128xf32>
    %c0_4 = arith.constant 0 : index
    %c0_5 = arith.constant 0 : index
    %c0_6 = arith.constant 0 : index
    %5 = vector.load %arg3[%c0_4, %c0_5, %c0_6] : memref<2x1x128xf32, #tpu.memory_space<vmem>>, vector<1x1x128xf32>
    %6 = vector.shape_cast %5 : vector<1x1x128xf32> to vector<1x128xf32>
    %7 = vector.broadcast %6 : vector<1x128xf32> to vector<8x128xf32>
    %8 = arith.addf %4, %7 : vector<8x128xf32>
    %cst_7 = arith.constant 0.000000e+00 : f32
    %9 = vector.broadcast %cst_7 : f32 to vector<8x128xf32>
    %10 = arith.maximumf %8, %9 : vector<8x128xf32>
    %11 = arith.truncf %10 : vector<8x128xf32> to vector<8x128xbf16>
    %c1 = arith.constant 1 : index
    %c0_8 = arith.constant 0 : index
    %c0_9 = arith.constant 0 : index
    %12 = vector.load %arg2[%c1, %c0_8, %c0_9] : memref<2x128x128xbf16, #tpu.memory_space<vmem>>, vector<1x128x128xbf16>
    %13 = vector.shape_cast %12 : vector<1x128x128xbf16> to vector<128x128xbf16>
    %cst_10 = arith.constant dense<0.000000e+00> : vector<8x128xf32>
    %14 = tpu.matmul %11, %13, %cst_10 {dimension_numbers = #tpu.dot_dimension_numbers<[1], [0], [0], [1], [0, 0, 1, 1], [], []>} : vector<8x128xbf16>, vector<128x128xbf16>, vector<8x128xf32> -> vector<8x128xf32>
    %c1_11 = arith.constant 1 : index
    %c0_12 = arith.constant 0 : index
    %c0_13 = arith.constant 0 : index
    %15 = vector.load %arg3[%c1_11, %c0_12, %c0_13] : memref<2x1x128xf32, #tpu.memory_space<vmem>>, vector<1x1x128xf32>
    %16 = vector.shape_cast %15 : vector<1x1x128xf32> to vector<1x128xf32>
    %17 = vector.broadcast %16 : vector<1x128xf32> to vector<8x128xf32>
    %18 = arith.addf %14, %17 : vector<8x128xf32>
    %cst_14 = arith.constant 0.000000e+00 : f32
    %19 = vector.broadcast %cst_14 : f32 to vector<8x128xf32>
    %20 = arith.maximumf %18, %19 : vector<8x128xf32>
    %21 = arith.truncf %20 : vector<8x128xf32> to vector<8x128xbf16>
    %c0_15 = arith.constant 0 : index
    %c0_16 = arith.constant 0 : index
    %22 = vector.load %arg4[%c0_15, %c0_16] : memref<128x128xbf16, #tpu.memory_space<vmem>>, vector<128x128xbf16>
    %cst_17 = arith.constant dense<0.000000e+00> : vector<8x128xf32>
    %23 = tpu.matmul %21, %22, %cst_17 {dimension_numbers = #tpu.dot_dimension_numbers<[1], [0], [0], [1], [0, 0, 1, 1], [], []>} : vector<8x128xbf16>, vector<128x128xbf16>, vector<8x128xf32> -> vector<8x128xf32>
    %c0_18 = arith.constant 0 : index
    %c0_19 = arith.constant 0 : index
    %24 = vector.load %arg5[%c0_18, %c0_19] : memref<1x128xf32, #tpu.memory_space<vmem>>, vector<1x128xf32>
    %25 = vector.broadcast %24 : vector<1x128xf32> to vector<8x128xf32>
    %26 = arith.addf %23, %25 : vector<8x128xf32>
    %c0_20 = arith.constant 0 : index
    %c0_21 = arith.constant 0 : index
    %27 = vector.load %arg6[%c0_20, %c0_21] : memref<8x128xf32, #tpu.memory_space<vmem>>, vector<8x128xf32>
    tpu.vector_store %arg6[%c0_20, %c0_21], %26 {strides = array<i32>} : memref<8x128xf32, #tpu.memory_space<vmem>>, vector<8x128xf32>,
    return
  }
  func.func @transform_0(%arg0: i32) -> (i32, i32) {
    %c0_i32 = arith.constant 0 : i32
    %c0_i32_0 = arith.constant 0 : i32
    return %arg0, %c0_i32 : i32, i32
  }
  func.func @transform_1(%arg0: i32) -> (i32, i32, i32) {
    %c0_i32 = arith.constant 0 : i32
    %c0_i32_0 = arith.constant 0 : i32
    %c0_i32_1 = arith.constant 0 : i32
    %c0_i32_2 = arith.constant 0 : i32
    return %c0_i32, %c0_i32_0, %c0_i32_1 : i32, i32, i32
  }
  func.func @transform_2(%arg0: i32) -> (i32, i32, i32) {
    %c0_i32 = arith.constant 0 : i32
    %c0_i32_0 = arith.constant 0 : i32
    %c0_i32_1 = arith.constant 0 : i32
    %c0_i32_2 = arith.constant 0 : i32
    return %c0_i32, %c0_i32_0, %c0_i32_1 : i32, i32, i32
  }
  func.func @transform_3(%arg0: i32) -> (i32, i32) {
    %c0_i32 = arith.constant 0 : i32
    %c0_i32_0 = arith.constant 0 : i32
    %c0_i32_1 = arith.constant 0 : i32
    return %c0_i32, %c0_i32_0 : i32, i32
  }
  func.func @transform_4(%arg0: i32) -> (i32, i32) {
    %c0_i32 = arith.constant 0 : i32
    %c0_i32_0 = arith.constant 0 : i32
    %c0_i32_1 = arith.constant 0 : i32
    return %c0_i32, %c0_i32_0 : i32, i32
  }
  func.func @transform_5(%arg0: i32) -> (i32, i32) {
    %c0_i32 = arith.constant 0 : i32
    %c0_i32_0 = arith.constant 0 : i32
    return %arg0, %c0_i32 : i32, i32
  }
}

</mosaic_0001>

<bundles_post_ra>
// kernel: tpu_custom_call.1
= control target key start
LH: loop header
LB: loop body
LE: loop exit
PB: predicated region body
PF: predicated region fallthrough
CT: control target
= control target key end

     0   :  { %10 = vsyncpa [#allocation3], 0  ;;  %s741_s0 = inlined_call_operand.hbm [shape: f32[8,128], index: 0, kind: input, shape index: {}]   ;;  %s742_s1 = inlined_call_operand.hbm [shape: bf16[2,128,128], index: 1, kind: input, shape index: {}]   ;;  %s743_s2 = inlined_call_operand.vmem [shape: f32[2,1,128], index: 2, kind: input, shape index: {}]   ;;  %s744_s3 = inlined_call_operand.hbm [shape: bf16[128,128], index: 3, kind: input, shape index: {}]   ;;  %s745_s4 = inlined_call_operand.vmem [shape: f32[1,128], index: 4, kind: input, shape index: {}]   ;;  %s746_s5 = inlined_call_operand.hbm [shape: f32[8,128], index: 5, kind: output, shape index: {}]  }
   0x1   :  { %11 = vsyncpa [#allocation6], 0 }
   0x2   :  { %12 = vsyncpa [#allocation4], 0  ;;  %s652_s18 = smov [#allocation5]  }
   0x3   :  { %s28_s19 = sshll.u32 %s652_s18, 4  ;;  %s29_s19 = int_to_ptr.vmem [resolvable:$true] %s28_s19 }
   0x4   :  { %s574_s20 = scalar_lea.vmem %s29_s19, 2048  ;;  %p579_p1 = scmp.lt.s32.totalorder %s29_s19, %s29_s19 }
   0x5   :  { %p575_p0 = scmp.ne.s32.totalorder %s29_s19, %s574_s20  ;;  %p580_p2 = scmp.lt.s32.totalorder %s574_s20, %s574_s20 }
   0x7   :  { %p581_p3 = por %p580_p2, %p579_p1 }
   0x9   :  { %p582_p4 = pnand %p581_p3, %p575_p0 }
   0xb   :  { %585 = shalt.err (!%p582_p4)
}
   0xc   :  { %s653_s21 = smov 64   ;;  %s654_s22 = smov 4  }
   0xd   :  { %34 = dma.hbm_to_vmem [thread:$0]  %s742_s1, 2048, %s29_s19, [#allocation6], %s653_s21, %s653_s21, %s654_s22  }
   0xe   :  { %s655_s25 = smov [#allocation2]   ;;  %s656_s27 = smov [#allocation7]  }
   0xf   :  { %s19_s26 = sshll.u32 %s655_s25, 4  ;;  %s42_s28 = sshll.u32 %s656_s27, 4  ;;  %s20_s26 = int_to_ptr.vmem [resolvable:$true] %s19_s26  ;;  %s43_s28 = int_to_ptr.vmem [resolvable:$true] %s42_s28 }
  0x10   :  { %s594_s29 = scalar_lea.vmem %s20_s26, 128  ;;  %p599_p6 = scmp.lt.s32.totalorder %s20_s26, %s20_s26 }
  0x11   :  { %p595_p5 = scmp.ne.s32.totalorder %s20_s26, %s594_s29  ;;  %p600_p7 = scmp.lt.s32.totalorder %s594_s29, %s594_s29 }
  0x13   :  { %p601_p8 = por %p600_p7, %p599_p6 }
  0x15   :  { %p602_p9 = pnand %p601_p8, %p595_p5 }
  0x17   :  { %605 = shalt.err (!%p602_p9)
}
  0x18   :  { %22 = dma.hbm_to_vmem [thread:$0]  %s741_s0, 128, %s20_s26, [#allocation3]  }
  0x19   :  { %s614_s7 = scalar_lea.vmem %s43_s28, 1024  ;;  %p619_p11 = scmp.lt.s32.totalorder %s43_s28, %s43_s28 }
  0x1a   :  { %p615_p10 = scmp.ne.s32.totalorder %s43_s28, %s614_s7  ;;  %p620_p12 = scmp.lt.s32.totalorder %s614_s7, %s614_s7 }
  0x1c   :  { %p621_p13 = por %p620_p12, %p619_p11 }
  0x1e   :  { %p622_p0 = pnand %p621_p13, %p615_p10 }
  0x20   :  { %625 = shalt.err (!%p622_p0)
}
  0x21   :  { %48 = dma.hbm_to_vmem [thread:$0]  %s744_s3, 1024, %s43_s28, [#allocation6], %s653_s21, %s653_s21, %s654_s22  }
  0x22   :  { %646 = dma.done.wait [#allocation3], 128  }
  0x23   :  { %647 = vsyncadd [#allocation3], 4294967168 }
  0x24   :  { %648 = dma.done.wait [#allocation6], 3072  }
  0x25   :  { %649 = vsyncadd [#allocation6], 4294964224  ;;  %v657_v0 = vmov 0.0   ;;  %vm658_vm0 = vmmov 0   ;;  %v542_v1 = vld [vmem:[#allocation5 + $0x38] sm:$0xff]   ;;  %v543_v2 = vld [vmem:[#allocation5 + $0x30] sm:$0xff]  }
  0x26   :  { %474 = vmatprep.subr.bf16.mxu0 %v657_v0  ;;  %490 = vmatprep.mubr.msk.bf16.mxu0 %vm658_vm0, %v657_v0  ;;  %v544_v3 = vld [vmem:[#allocation5 + $0x28] sm:$0xff]   ;;  %v550_v4 = vld [vmem:[#allocation5 + $0x78] sm:$0xff]   ;;  %v545_v5 = vld [vmem:[#allocation5 + $0x20] sm:$0xff]   ;;  %s659_s13 = smov [#allocation8]  }
  0x27   :  { %494 = vmatprep.subr.bf16.mxu1 %v657_v0  ;;  %510 = vmatprep.mubr.msk.bf16.mxu1 %vm658_vm0, %v657_v0  ;;  %v551_v6 = vld [vmem:[#allocation5 + $0x70] sm:$0xff]   ;;  %v546_v7 = vld [vmem:[#allocation5 + $0x18] sm:$0xff]   ;;  %v552_v8 = vld [vmem:[#allocation5 + $0x68] sm:$0xff]   ;;  %s409_s14 = sshll.u32 %s659_s13, 4  ;;  %s410_s14 = int_to_ptr.vmem [resolvable:$true] %s409_s14 }
  0x28   :  { %475 = vmatpush3.bf16.msra.mxu0 %v542_v1  ;;  %495 = vmatpush3.bf16.msra.mxu1 %v550_v4  ;;  %v547_v9 = vld [vmem:[#allocation5 + $0x10] sm:$0xff]   ;;  %v553_v10 = vld [vmem:[#allocation5 + $0x60] sm:$0xff]   ;;  %v548_v11 = vld [vmem:[#allocation5 + $0x8] sm:$0xff]   ;;  %p631_p2 = scmp.lt.s32.totalorder %s410_s14, %s410_s14 }
  0x29   :  { %476 = vmatprep.subr.bf16.mxu0 %v657_v0  ;;  %496 = vmatprep.subr.bf16.mxu1 %v657_v0  ;;  %v554_v12 = vld [vmem:[#allocation5 + $0x58] sm:$0xff]   ;;  %v549_v13 = vld [vmem:[#allocation5] sm:$0xff]   ;;  %v555_v15 = vld [vmem:[#allocation5 + $0x50] sm:$0xff]  }
  0x2a   :  { %v61_v14 = vld [vmem:[#allocation2] sm:$0xff]  ;;  %v556_v17 = vld [vmem:[#allocation5 + $0x48] sm:$0xff]   ;;  %v557_v18 = vld [vmem:[#allocation5 + $0x40] sm:$0xff]  }
  0x2b   :  { %v62_v16 = vpack.c.bf16 %v61_v14, %v61_v14  ;;  %v558_v19 = vld [vmem:[#allocation7 + $0x38] sm:$0xff]   ;;  %v559_v20 = vld [vmem:[#allocation7 + $0x30] sm:$0xff]   ;;  %v560_v21 = vld [vmem:[#allocation7 + $0x28] sm:$0xff]  }
  0x2c   :  { %477 = vmatpush3.bf16.msra.mxu0 %v543_v2  ;;  %497 = vmatpush3.bf16.msra.mxu1 %v551_v6  ;;  %v561_v22 = vld [vmem:[#allocation7 + $0x20] sm:$0xff]   ;;  %v562_v23 = vld [vmem:[#allocation7 + $0x18] sm:$0xff]   ;;  %v563_v24 = vld [vmem:[#allocation7 + $0x10] sm:$0xff]  }
  0x2d   :  { %478 = vmatprep.subr.bf16.mxu0 %v657_v0  ;;  %498 = vmatprep.subr.bf16.mxu1 %v657_v0  ;;  %v419_v25 = vld [vmem:[%s743_s2] ss:$0 sm:$0xff]  ;;  %v564_v33 = vld [vmem:[#allocation7 + $0x8] sm:$0xff]   ;;  %v565_v34 = vld [vmem:[#allocation7] sm:$0xff]  }
  0x2e   :  { %v429_v35 = vld [vmem:[%s743_s2 + $0x1] ss:$0 sm:$0xff]  ;;  %v438_v43 = vld [vmem:[%s745_s4] ss:$0 sm:$0xff]  ;;  %s626_s2 = scalar_lea.vmem %s410_s14, 128 }
  0x2f   :  { %p627_p1 = scmp.ne.s32.totalorder %s410_s14, %s626_s2  ;;  %p632_p3 = scmp.lt.s32.totalorder %s626_s2, %s626_s2 }
  0x30   :  { %479 = vmatpush3.bf16.msra.mxu0 %v544_v3  ;;  %499 = vmatpush3.bf16.msra.mxu1 %v552_v8 }
  0x31   :  { %480 = vmatprep.subr.bf16.mxu0 %v657_v0  ;;  %500 = vmatprep.subr.bf16.mxu1 %v657_v0  ;;  %p633_p4 = por %p632_p3, %p631_p2 }
  0x33   :  { %p634_p5 = pnand %p633_p4, %p627_p1 }
  0x34   :  { %481 = vmatpush3.bf16.msra.mxu0 %v545_v5  ;;  %501 = vmatpush3.bf16.msra.mxu1 %v553_v10 }
  0x35   :  { %482 = vmatprep.subr.bf16.mxu0 %v657_v0  ;;  %502 = vmatprep.subr.bf16.mxu1 %v657_v0 }
  0x38   :  { %483 = vmatpush3.bf16.msra.mxu0 %v546_v7  ;;  %503 = vmatpush3.bf16.msra.mxu1 %v554_v12 }
  0x39   :  { %484 = vmatprep.subr.bf16.mxu0 %v657_v0  ;;  %504 = vmatprep.subr.bf16.mxu1 %v657_v0 }
  0x3c   :  { %485 = vmatpush3.bf16.msra.mxu0 %v547_v9  ;;  %505 = vmatpush3.bf16.msra.mxu1 %v555_v15 }
  0x3d   :  { %486 = vmatprep.subr.bf16.mxu0 %v657_v0  ;;  %506 = vmatprep.subr.bf16.mxu1 %v657_v0 }
  0x40   :  { %487 = vmatpush3.bf16.msra.mxu0 %v548_v11  ;;  %507 = vmatpush3.bf16.msra.mxu1 %v556_v17 }
  0x41   :  { %488 = vmatprep.subr.bf16.mxu0 %v657_v0  ;;  %508 = vmatprep.subr.bf16.mxu1 %v657_v0 }
  0x44   :  { %489 = vmatpush3.bf16.msra.mxu0 %v549_v13  ;;  %509 = vmatpush3.bf16.msra.mxu1 %v557_v18 }
  0x45   :  { %514 = vmatprep.subr.bf16.mxu0 %v657_v0 }
  0x47   :  { %491 = vmatmul.mubr.bf16.vlgmr.msra.gmra.mxu0 %v62_v16 }
  0x48   :  { %530 = vmatprep.mubr.msk.bf16.mxu0 %vm658_vm0, %v657_v0  ;;  %515 = vmatpush3.bf16.msra.mxu0 %v558_v19 }
  0x49   :  { %516 = vmatprep.subr.bf16.mxu0 %v657_v0 }
  0x4c   :  { %517 = vmatpush3.bf16.msra.mxu0 %v559_v20 }
  0x4d   :  { %518 = vmatprep.subr.bf16.mxu0 %v657_v0 }
  0x50   :  { %519 = vmatpush3.bf16.msra.mxu0 %v560_v21 }
  0x51   :  { %520 = vmatprep.subr.bf16.mxu0 %v657_v0 }
  0x54   :  { %521 = vmatpush3.bf16.msra.mxu0 %v561_v22 }
  0x55   :  { %522 = vmatprep.subr.bf16.mxu0 %v657_v0 }
  0x58   :  { %523 = vmatpush3.bf16.msra.mxu0 %v562_v23 }
  0x59   :  { %524 = vmatprep.subr.bf16.mxu0 %v657_v0 }
  0x5c   :  { %525 = vmatpush3.bf16.msra.mxu0 %v563_v24 }
  0x5d   :  { %526 = vmatprep.subr.bf16.mxu0 %v657_v0 }
  0x60   :  { %527 = vmatpush3.bf16.msra.mxu0 %v564_v33 }
  0x61   :  { %528 = vmatprep.subr.bf16.mxu0 %v657_v0 }
  0x64   :  { %529 = vmatpush3.bf16.msra.mxu0 %v565_v34 }
 0x107   :  { %v168_v26 = vpop.f32.mrf.mxu0 }
 0x108   :  { %v169_v27 = vadd.f32 %v419_v25, %v168_v26 }
 0x109   :  { %v492_v28 = vpop.f32.mrf.mxu0 }
 0x10a   :  { %v174_v29 = vmax.f32 %v169_v27, 0.0 }
 0x10b   :  { %v171_v30 = vpop.f32.mrf.mxu0 }
 0x10c   :  { %v175_v31 = vpack.c.bf16 %v174_v29, %v174_v29 }
 0x10d   :  { %v493_v32 = vpop.f32.mrf.mxu0 }
 0x10e   :  { %511 = vmatmul.mubr.bf16.vlgmr.msra.gmra.mxu1 %v175_v31 }
 0x1ce   :  { %v283_v36 = vpop.f32.mrf.mxu1 }
 0x1cf   :  { %v284_v37 = vadd.f32 %v429_v35, %v283_v36 }
 0x1d0   :  { %v512_v38 = vpop.f32.mrf.mxu1 }
 0x1d1   :  { %v289_v39 = vmax.f32 %v284_v37, 0.0 }
 0x1d2   :  { %v286_v40 = vpop.f32.mrf.mxu1 }
 0x1d3   :  { %v290_v41 = vpack.c.bf16 %v289_v39, %v289_v39 }
 0x1d4   :  { %v513_v42 = vpop.f32.mrf.mxu1 }
 0x1d5   :  { %531 = vmatmul.mubr.bf16.vlgmr.msra.gmra.mxu0 %v290_v41 }
 0x295   :  { %v396_v44 = vpop.f32.mrf.mxu0 }
 0x296   :  { %v397_v45 = vadd.f32 %v438_v43, %v396_v44 }
 0x297   :  { %v532_v46 = vpop.f32.mrf.mxu0 }
 0x298   :  { %402 = vst [vmem:[#allocation8] sm:$0xff] %v397_v45 }
 0x299   :  { %v399_v47 = vpop.f32.mrf.mxu0 }
 0x29a   :  { %637 = shalt.err (!%p634_p5)
}
 0x29b   :  { %412 = dma.vmem_to_hbm [thread:$0]  %s410_s14, 128, %s746_s5, [#allocation4]   ;;  %v533_v48 = vpop.f32.mrf.mxu0 }
 0x29c   :  { %650 = dma.done.wait [#allocation4], 128  }
 0x29d   :  { %651 = vsyncadd [#allocation4], 4294967168 }
 0x29e   :  { %416 = vsyncpa [#allocation3], 1 }
 0x29f   :  { %417 = vsyncpa [#allocation6], 1 }
 0x2a0   :  { %418 = vsyncpa [#allocation4], 1 }

</bundles_post_ra>
